<compile_context>
chip_gen: v7x
topology: tpu7x:2x2x1
jax: 0.10.0
libtpu: 0.0.40
codegen_flags: <defaults>
</compile_context>

<pallas_src>
import functools

import jax
import jax.numpy as jnp
from jax import lax
from jax.experimental import pallas as pl
from jax.experimental.pallas import tpu as pltpu


# ------------------------------ fused kernel --------------------------------

def _mha_kernel(q_ref, k_ref, v_ref, wqkv_ref, bqkv_ref, wo_ref, bo_ref,
                o_ref, *, num_heads):
    """One batch element per grid step.

    q_ref/k_ref/v_ref : (1, S, D)        f32
    wqkv_ref          : (D, 3*hidden)    bf16   [wq*scale | wk | wv]
    bqkv_ref          : (1, 3*hidden)    f32    [bq*scale | bk | bv]
    wo_ref            : (hidden, hidden) bf16
    bo_ref            : (1, hidden)      f32
    o_ref             : (1, S, hidden)   f32
    """
    hidden = wo_ref.shape[0]
    dh = hidden // num_heads

    wqkv = wqkv_ref[...]                      # (D, 3*hidden) bf16, VMEM-resident
    bqkv = bqkv_ref[...]                      # (1, 3*hidden) f32

    def proj(x_ref, which):
        x = x_ref[0].astype(jnp.bfloat16)     # (S, D) -> bf16 for the MXU
        w = wqkv[:, which * hidden:(which + 1) * hidden]
        b = bqkv[:, which * hidden:(which + 1) * hidden]
        return jnp.dot(x, w, preferred_element_type=jnp.float32) + b

    # 1/sqrt(head_dim) is already folded into wq/bq on the host.
    qp = proj(q_ref, 0)                       # (S, hidden) f32, pre-scaled
    kp = proj(k_ref, 1)                       # (S, hidden) f32
    vp = proj(v_ref, 2)                       # (S, hidden) f32

    # TODO(synk): reference's attn_mask handling multiplies the scores by zero
    # (mask of ones -> (1-1)*-10000); standard unmasked attention implemented.
    head_outs = []
    for h in range(num_heads):                # static unroll over heads
        sl = slice(h * dh, (h + 1) * dh)
        qh = qp[:, sl].astype(jnp.bfloat16)   # (S, dh)
        kh = kp[:, sl].astype(jnp.bfloat16)   # (S, dh)
        vh = vp[:, sl].astype(jnp.bfloat16)   # (S, dh)

        # Contract last dims directly -- no in-kernel transpose of K.
        s = lax.dot_general(qh, kh, (((1,), (1,)), ((), ())),
                            preferred_element_type=jnp.float32)   # (S, S) f32

        # Softmax over keys, in f32 (works on v5e which lacks bf16 VPU/EUP).
        m = jnp.max(s, axis=-1, keepdims=True)
        p = jnp.exp(s - m)
        l = jnp.sum(p, axis=-1, keepdims=True)
        p = p * pl.reciprocal(l, approx=True)                     # EUP recip

        head_outs.append(jnp.dot(p.astype(jnp.bfloat16), vh,
                                 preferred_element_type=jnp.float32))

    attn = jnp.concatenate(head_outs, axis=-1)                    # (S, hidden)

    out = jnp.dot(attn.astype(jnp.bfloat16), wo_ref[...],
                  preferred_element_type=jnp.float32) + bo_ref[...]
    o_ref[0] = out                             # single dense store per step


# ------------------------------ python wrapper -------------------------------

def multi_head_attention(q, k, v, params, num_heads, attn_mask=None):
    """q, k, v: (B, S, emb_dim) f32  ->  (B, S, hidden_dim) f32."""
    if attn_mask is not None:
        # TODO(synk): reference mask path is shape-invalid / zeroes the scores;
        # only the attn_mask=None path is implemented.
        raise NotImplementedError("attn_mask is not supported")

    b, s, d = q.shape
    hidden = params["wo"].shape[0]
    assert hidden % num_heads == 0
    dh = hidden // num_heads
    scale = 1.0 / float(dh) ** 0.5

    # Fold the three projection weights into one (D, 3*hidden) bf16 operand,
    # with the 1/sqrt(head_dim) scale baked into the Q projection.
    wqkv = jnp.concatenate(
        [params["wq"] * scale, params["wk"], params["wv"]],
        axis=1).astype(jnp.bfloat16)
    bqkv = jnp.concatenate(
        [params["bq"] * scale, params["bk"], params["bv"]]
    ).reshape(1, 3 * hidden).astype(jnp.float32)
    wo = params["wo"].astype(jnp.bfloat16)
    bo = params["bo"].reshape(1, hidden).astype(jnp.float32)

    x_spec = pl.BlockSpec((1, s, d), lambda i: (i, 0, 0))
    full2d = lambda shape: pl.BlockSpec(shape, lambda i: (0, 0))

    return pl.pallas_call(
        functools.partial(_mha_kernel, num_heads=num_heads),
        out_shape=jax.ShapeDtypeStruct((b, s, hidden), jnp.float32),
        grid=(b,),
        in_specs=[x_spec, x_spec, x_spec,
                  full2d((d, 3 * hidden)),
                  full2d((1, 3 * hidden)),
                  full2d((hidden, hidden)),
                  full2d((1, hidden))],
        out_specs=pl.BlockSpec((1, s, hidden), lambda i: (i, 0, 0)),
        compiler_params=pltpu.CompilerParams(
            dimension_semantics=("parallel",)),
    )(q, k, v, wqkv, bqkv, wo, bo)


# ------------------------- pure-JAX reference (check) ------------------------

def mha_reference(q, k, v, params, num_heads):
    b, s, d = q.shape
    hidden = params["wo"].shape[0]
    dh = hidden // num_heads

    def proj(x, w, bb):
        return jnp.einsum("bsd,dh->bsh", x, w) + bb

    qp = proj(q, params["wq"], params["bq"])
    kp = proj(k, params["wk"], params["bk"])
    vp = proj(v, params["wv"], params["bv"])

    def split(t):
        return t.reshape(b, s, num_heads, dh).transpose(0, 2, 1, 3)

    qh, kh, vh = split(qp), split(kp), split(vp)
    scores = jnp.einsum("bhqd,bhkd->bhqk", qh, kh) / jnp.sqrt(float(dh))
    p = jax.nn.softmax(scores, axis=-1)
    o = jnp.einsum("bhqk,bhkd->bhqd", p, vh)
    o = o.transpose(0, 2, 1, 3).reshape(b, s, hidden)
    return jnp.einsum("bsh,hk->bsk", o, params["wo"]) + params["bo"]


# ---------------------------- parameter init ---------------------------------

def init_params(key, emb_dim, hidden_dim):
    ks = jax.random.split(key, 8)
    w = lambda kk, shp: jax.random.normal(kk, shp, jnp.float32) * 0.02
    bvec = lambda kk, n: jax.random.normal(kk, (n,), jnp.float32) * 0.02
    return {
        "wq": w(ks[0], (emb_dim, hidden_dim)), "bq": bvec(ks[1], hidden_dim),
        "wk": w(ks[2], (emb_dim, hidden_dim)), "bk": bvec(ks[3], hidden_dim),
        "wv": w(ks[4], (emb_dim, hidden_dim)), "bv": bvec(ks[5], hidden_dim),
        "wo": w(ks[6], (hidden_dim, hidden_dim)), "bo": bvec(ks[7], hidden_dim),
    }


# ---------------------------------- main -------------------------------------

if __name__ == "__main__":
    batch, seq, emb_dim, hidden_dim, num_heads = 2, 8, 32, 32, 4

    key = jax.random.PRNGKey(0)
    kp_, kq_, kk_, kv_ = jax.random.split(key, 4)
    params = init_params(kp_, emb_dim, hidden_dim)
    q = jax.random.normal(kq_, (batch, seq, emb_dim), jnp.float32)
    k = jax.random.normal(kk_, (batch, seq, emb_dim), jnp.float32)
    v = jax.random.normal(kv_, (batch, seq, emb_dim), jnp.float32)

    out = multi_head_attention(q, k, v, params, num_heads)
    jax.block_until_ready(out)
    assert out.shape == (batch, seq, hidden_dim)

    ref = mha_reference(q, k, v, params, num_heads)
    max_err = float(jnp.max(jnp.abs(out - ref)))
    assert max_err < 5e-2, f"mismatch vs reference: {max_err}"

    print("KERNEL_OK")
</pallas_src>

<mosaic_0001>
module attributes {stable_mosaic.version = 11 : i64} {
  func.func @_mha_kernel(%arg0: i32, %arg1: memref<1x8x32xf32, #tpu.memory_space<vmem>>, %arg2: memref<1x8x32xf32, #tpu.memory_space<vmem>>, %arg3: memref<1x8x32xf32, #tpu.memory_space<vmem>>, %arg4: memref<32x96xbf16, #tpu.memory_space<vmem>>, %arg5: memref<1x96xf32, #tpu.memory_space<vmem>>, %arg6: memref<32x32xbf16, #tpu.memory_space<vmem>>, %arg7: memref<1x32xf32, #tpu.memory_space<vmem>>, %arg8: memref<1x8x32xf32, #tpu.memory_space<vmem>>) attributes {dimension_semantics = [#tpu.dimension_semantics<parallel>], iteration_bounds = array<i64: 2>, scalar_prefetch = 0 : i64, scratch_operands = 0 : i64, tpu.core_type = #tpu.core_type<tc>, window_params = [{transform_indices = @transform_0, window_bounds = array<i64: 1, 8, 32>}, {transform_indices = @transform_1, window_bounds = array<i64: 1, 8, 32>}, {transform_indices = @transform_2, window_bounds = array<i64: 1, 8, 32>}, {pipeline_mode = #tpu.pipeline_mode<synchronous>, transform_indices = @transform_3, window_bounds = array<i64: 32, 96>}, {pipeline_mode = #tpu.pipeline_mode<synchronous>, transform_indices = @transform_4, window_bounds = array<i64: 1, 96>}, {pipeline_mode = #tpu.pipeline_mode<synchronous>, transform_indices = @transform_5, window_bounds = array<i64: 32, 32>}, {pipeline_mode = #tpu.pipeline_mode<synchronous>, transform_indices = @transform_6, window_bounds = array<i64: 1, 32>}, {transform_indices = @transform_7, window_bounds = array<i64: 1, 8, 32>}]} {
    %c0 = arith.constant 0 : index
    %c0_0 = arith.constant 0 : index
    %0 = vector.load %arg4[%c0, %c0_0] : memref<32x96xbf16, #tpu.memory_space<vmem>>, vector<32x96xbf16>
    %c0_1 = arith.constant 0 : index
    %c0_2 = arith.constant 0 : index
    %1 = vector.load %arg5[%c0_1, %c0_2] : memref<1x96xf32, #tpu.memory_space<vmem>>, vector<1x96xf32>
    %c0_3 = arith.constant 0 : index
    %c0_4 = arith.constant 0 : index
    %c0_5 = arith.constant 0 : index
    %2 = vector.load %arg1[%c0_3, %c0_4, %c0_5] : memref<1x8x32xf32, #tpu.memory_space<vmem>>, vector<1x8x32xf32>
    %3 = vector.shape_cast %2 : vector<1x8x32xf32> to vector<8x32xf32>
    %4 = arith.truncf %3 : vector<8x32xf32> to vector<8x32xbf16>
    %5 = vector.extract_strided_slice %0 {offsets = [0, 0], sizes = [32, 32], strides = [1, 1]} : vector<32x96xbf16> to vector<32x32xbf16>
    %6 = vector.extract_strided_slice %1 {offsets = [0, 0], sizes = [1, 32], strides = [1, 1]} : vector<1x96xf32> to vector<1x32xf32>
    %cst = arith.constant dense<0.000000e+00> : vector<8x32xf32>
    %7 = tpu.matmul %4, %5, %cst {dimension_numbers = #tpu.dot_dimension_numbers<[1], [0], [0], [1], [0, 0, 1, 1], [], []>} : vector<8x32xbf16>, vector<32x32xbf16>, vector<8x32xf32> -> vector<8x32xf32>
    %8 = vector.broadcast %6 : vector<1x32xf32> to vector<8x32xf32>
    %9 = arith.addf %7, %8 : vector<8x32xf32>
    %c0_6 = arith.constant 0 : index
    %c0_7 = arith.constant 0 : index
    %c0_8 = arith.constant 0 : index
    %10 = vector.load %arg2[%c0_6, %c0_7, %c0_8] : memref<1x8x32xf32, #tpu.memory_space<vmem>>, vector<1x8x32xf32>
    %11 = vector.shape_cast %10 : vector<1x8x32xf32> to vector<8x32xf32>
    %12 = arith.truncf %11 : vector<8x32xf32> to vector<8x32xbf16>
    %13 = vector.extract_strided_slice %0 {offsets = [0, 32], sizes = [32, 32], strides = [1, 1]} : vector<32x96xbf16> to vector<32x32xbf16>
    %14 = vector.extract_strided_slice %1 {offsets = [0, 32], sizes = [1, 32], strides = [1, 1]} : vector<1x96xf32> to vector<1x32xf32>
    %cst_9 = arith.constant dense<0.000000e+00> : vector<8x32xf32>
    %15 = tpu.matmul %12, %13, %cst_9 {dimension_numbers = #tpu.dot_dimension_numbers<[1], [0], [0], [1], [0, 0, 1, 1], [], []>} : vector<8x32xbf16>, vector<32x32xbf16>, vector<8x32xf32> -> vector<8x32xf32>
    %16 = vector.broadcast %14 : vector<1x32xf32> to vector<8x32xf32>
    %17 = arith.addf %15, %16 : vector<8x32xf32>
    %c0_10 = arith.constant 0 : index
    %c0_11 = arith.constant 0 : index
    %c0_12 = arith.constant 0 : index
    %18 = vector.load %arg3[%c0_10, %c0_11, %c0_12] : memref<1x8x32xf32, #tpu.memory_space<vmem>>, vector<1x8x32xf32>
    %19 = vector.shape_cast %18 : vector<1x8x32xf32> to vector<8x32xf32>
    %20 = arith.truncf %19 : vector<8x32xf32> to vector<8x32xbf16>
    %21 = vector.extract_strided_slice %0 {offsets = [0, 64], sizes = [32, 32], strides = [1, 1]} : vector<32x96xbf16> to vector<32x32xbf16>
    %22 = vector.extract_strided_slice %1 {offsets = [0, 64], sizes = [1, 32], strides = [1, 1]} : vector<1x96xf32> to vector<1x32xf32>
    %cst_13 = arith.constant dense<0.000000e+00> : vector<8x32xf32>
    %23 = tpu.matmul %20, %21, %cst_13 {dimension_numbers = #tpu.dot_dimension_numbers<[1], [0], [0], [1], [0, 0, 1, 1], [], []>} : vector<8x32xbf16>, vector<32x32xbf16>, vector<8x32xf32> -> vector<8x32xf32>
    %24 = vector.broadcast %22 : vector<1x32xf32> to vector<8x32xf32>
    %25 = arith.addf %23, %24 : vector<8x32xf32>
    %26 = vector.extract_strided_slice %9 {offsets = [0, 0], sizes = [8, 8], strides = [1, 1]} : vector<8x32xf32> to vector<8x8xf32>
    %27 = arith.truncf %26 : vector<8x8xf32> to vector<8x8xbf16>
    %28 = vector.extract_strided_slice %17 {offsets = [0, 0], sizes = [8, 8], strides = [1, 1]} : vector<8x32xf32> to vector<8x8xf32>
    %29 = arith.truncf %28 : vector<8x8xf32> to vector<8x8xbf16>
    %30 = vector.extract_strided_slice %25 {offsets = [0, 0], sizes = [8, 8], strides = [1, 1]} : vector<8x32xf32> to vector<8x8xf32>
    %31 = arith.truncf %30 : vector<8x8xf32> to vector<8x8xbf16>
    %cst_14 = arith.constant dense<0.000000e+00> : vector<8x8xf32>
    %32 = tpu.matmul %27, %29, %cst_14 {dimension_numbers = #tpu.dot_dimension_numbers<[1], [1], [0], [0], [0, 0, 1, 0], [], []>} : vector<8x8xbf16>, vector<8x8xbf16>, vector<8x8xf32> -> vector<8x8xf32>
    %cst_15 = arith.constant dense<0xFF800000> : vector<8xf32>
    %33 = vector.multi_reduction <maximumf>, %32, %cst_15 [1] : vector<8x8xf32> to vector<8xf32>
    %34 = vector.shape_cast %33 : vector<8xf32> to vector<8x1xf32>
    %35 = vector.broadcast %34 : vector<8x1xf32> to vector<8x8xf32>
    %36 = arith.subf %32, %35 : vector<8x8xf32>
    %37 = math.exp %36 : vector<8x8xf32>
    %cst_16 = arith.constant dense<0.000000e+00> : vector<8xf32>
    %38 = vector.multi_reduction <add>, %37, %cst_16 [1] : vector<8x8xf32> to vector<8xf32>
    %39 = vector.shape_cast %38 : vector<8xf32> to vector<8x1xf32>
    %40 = tpu.reciprocal %39 {approx = true} : vector<8x1xf32> -> vector<8x1xf32>
    %41 = vector.broadcast %40 : vector<8x1xf32> to vector<8x8xf32>
    %42 = arith.mulf %37, %41 : vector<8x8xf32>
    %43 = arith.truncf %42 : vector<8x8xf32> to vector<8x8xbf16>
    %cst_17 = arith.constant dense<0.000000e+00> : vector<8x8xf32>
    %44 = tpu.matmul %43, %31, %cst_17 {dimension_numbers = #tpu.dot_dimension_numbers<[1], [0], [0], [1], [0, 0, 1, 1], [], []>} : vector<8x8xbf16>, vector<8x8xbf16>, vector<8x8xf32> -> vector<8x8xf32>
    %45 = vector.extract_strided_slice %9 {offsets = [0, 8], sizes = [8, 8], strides = [1, 1]} : vector<8x32xf32> to vector<8x8xf32>
    %46 = arith.truncf %45 : vector<8x8xf32> to vector<8x8xbf16>
    %47 = vector.extract_strided_slice %17 {offsets = [0, 8], sizes = [8, 8], strides = [1, 1]} : vector<8x32xf32> to vector<8x8xf32>
    %48 = arith.truncf %47 : vector<8x8xf32> to vector<8x8xbf16>
    %49 = vector.extract_strided_slice %25 {offsets = [0, 8], sizes = [8, 8], strides = [1, 1]} : vector<8x32xf32> to vector<8x8xf32>
    %50 = arith.truncf %49 : vector<8x8xf32> to vector<8x8xbf16>
    %cst_18 = arith.constant dense<0.000000e+00> : vector<8x8xf32>
    %51 = tpu.matmul %46, %48, %cst_18 {dimension_numbers = #tpu.dot_dimension_numbers<[1], [1], [0], [0], [0, 0, 1, 0], [], []>} : vector<8x8xbf16>, vector<8x8xbf16>, vector<8x8xf32> -> vector<8x8xf32>
    %cst_19 = arith.constant dense<0xFF800000> : vector<8xf32>
    %52 = vector.multi_reduction <maximumf>, %51, %cst_19 [1] : vector<8x8xf32> to vector<8xf32>
    %53 = vector.shape_cast %52 : vector<8xf32> to vector<8x1xf32>
    %54 = vector.broadcast %53 : vector<8x1xf32> to vector<8x8xf32>
    %55 = arith.subf %51, %54 : vector<8x8xf32>
    %56 = math.exp %55 : vector<8x8xf32>
    %cst_20 = arith.constant dense<0.000000e+00> : vector<8xf32>
    %57 = vector.multi_reduction <add>, %56, %cst_20 [1] : vector<8x8xf32> to vector<8xf32>
    %58 = vector.shape_cast %57 : vector<8xf32> to vector<8x1xf32>
    %59 = tpu.reciprocal %58 {approx = true} : vector<8x1xf32> -> vector<8x1xf32>
    %60 = vector.broadcast %59 : vector<8x1xf32> to vector<8x8xf32>
    %61 = arith.mulf %56, %60 : vector<8x8xf32>
    %62 = arith.truncf %61 : vector<8x8xf32> to vector<8x8xbf16>
    %cst_21 = arith.constant dense<0.000000e+00> : vector<8x8xf32>
    %63 = tpu.matmul %62, %50, %cst_21 {dimension_numbers = #tpu.dot_dimension_numbers<[1], [0], [0], [1], [0, 0, 1, 1], [], []>} : vector<8x8xbf16>, vector<8x8xbf16>, vector<8x8xf32> -> vector<8x8xf32>
    %64 = vector.extract_strided_slice %9 {offsets = [0, 16], sizes = [8, 8], strides = [1, 1]} : vector<8x32xf32> to vector<8x8xf32>
    %65 = arith.truncf %64 : vector<8x8xf32> to vector<8x8xbf16>
    %66 = vector.extract_strided_slice %17 {offsets = [0, 16], sizes = [8, 8], strides = [1, 1]} : vector<8x32xf32> to vector<8x8xf32>
    %67 = arith.truncf %66 : vector<8x8xf32> to vector<8x8xbf16>
    %68 = vector.extract_strided_slice %25 {offsets = [0, 16], sizes = [8, 8], strides = [1, 1]} : vector<8x32xf32> to vector<8x8xf32>
    %69 = arith.truncf %68 : vector<8x8xf32> to vector<8x8xbf16>
    %cst_22 = arith.constant dense<0.000000e+00> : vector<8x8xf32>
    %70 = tpu.matmul %65, %67, %cst_22 {dimension_numbers = #tpu.dot_dimension_numbers<[1], [1], [0], [0], [0, 0, 1, 0], [], []>} : vector<8x8xbf16>, vector<8x8xbf16>, vector<8x8xf32> -> vector<8x8xf32>
    %cst_23 = arith.constant dense<0xFF800000> : vector<8xf32>
    %71 = vector.multi_reduction <maximumf>, %70, %cst_23 [1] : vector<8x8xf32> to vector<8xf32>
    %72 = vector.shape_cast %71 : vector<8xf32> to vector<8x1xf32>
    %73 = vector.broadcast %72 : vector<8x1xf32> to vector<8x8xf32>
    %74 = arith.subf %70, %73 : vector<8x8xf32>
    %75 = math.exp %74 : vector<8x8xf32>
    %cst_24 = arith.constant dense<0.000000e+00> : vector<8xf32>
    %76 = vector.multi_reduction <add>, %75, %cst_24 [1] : vector<8x8xf32> to vector<8xf32>
    %77 = vector.shape_cast %76 : vector<8xf32> to vector<8x1xf32>
    %78 = tpu.reciprocal %77 {approx = true} : vector<8x1xf32> -> vector<8x1xf32>
    %79 = vector.broadcast %78 : vector<8x1xf32> to vector<8x8xf32>
    %80 = arith.mulf %75, %79 : vector<8x8xf32>
    %81 = arith.truncf %80 : vector<8x8xf32> to vector<8x8xbf16>
    %cst_25 = arith.constant dense<0.000000e+00> : vector<8x8xf32>
    %82 = tpu.matmul %81, %69, %cst_25 {dimension_numbers = #tpu.dot_dimension_numbers<[1], [0], [0], [1], [0, 0, 1, 1], [], []>} : vector<8x8xbf16>, vector<8x8xbf16>, vector<8x8xf32> -> vector<8x8xf32>
    %83 = vector.extract_strided_slice %9 {offsets = [0, 24], sizes = [8, 8], strides = [1, 1]} : vector<8x32xf32> to vector<8x8xf32>
    %84 = arith.truncf %83 : vector<8x8xf32> to vector<8x8xbf16>
    %85 = vector.extract_strided_slice %17 {offsets = [0, 24], sizes = [8, 8], strides = [1, 1]} : vector<8x32xf32> to vector<8x8xf32>
    %86 = arith.truncf %85 : vector<8x8xf32> to vector<8x8xbf16>
    %87 = vector.extract_strided_slice %25 {offsets = [0, 24], sizes = [8, 8], strides = [1, 1]} : vector<8x32xf32> to vector<8x8xf32>
    %88 = arith.truncf %87 : vector<8x8xf32> to vector<8x8xbf16>
    %cst_26 = arith.constant dense<0.000000e+00> : vector<8x8xf32>
    %89 = tpu.matmul %84, %86, %cst_26 {dimension_numbers = #tpu.dot_dimension_numbers<[1], [1], [0], [0], [0, 0, 1, 0], [], []>} : vector<8x8xbf16>, vector<8x8xbf16>, vector<8x8xf32> -> vector<8x8xf32>
    %cst_27 = arith.constant dense<0xFF800000> : vector<8xf32>
    %90 = vector.multi_reduction <maximumf>, %89, %cst_27 [1] : vector<8x8xf32> to vector<8xf32>
    %91 = vector.shape_cast %90 : vector<8xf32> to vector<8x1xf32>
    %92 = vector.broadcast %91 : vector<8x1xf32> to vector<8x8xf32>
    %93 = arith.subf %89, %92 : vector<8x8xf32>
    %94 = math.exp %93 : vector<8x8xf32>
    %cst_28 = arith.constant dense<0.000000e+00> : vector<8xf32>
    %95 = vector.multi_reduction <add>, %94, %cst_28 [1] : vector<8x8xf32> to vector<8xf32>
    %96 = vector.shape_cast %95 : vector<8xf32> to vector<8x1xf32>
    %97 = tpu.reciprocal %96 {approx = true} : vector<8x1xf32> -> vector<8x1xf32>
    %98 = vector.broadcast %97 : vector<8x1xf32> to vector<8x8xf32>
    %99 = arith.mulf %94, %98 : vector<8x8xf32>
    %100 = arith.truncf %99 : vector<8x8xf32> to vector<8x8xbf16>
    %cst_29 = arith.constant dense<0.000000e+00> : vector<8x8xf32>
    %101 = tpu.matmul %100, %88, %cst_29 {dimension_numbers = #tpu.dot_dimension_numbers<[1], [0], [0], [1], [0, 0, 1, 1], [], []>} : vector<8x8xbf16>, vector<8x8xbf16>, vector<8x8xf32> -> vector<8x8xf32>
    %102 = tpu.concatenate %44, %63, %82, %101 in 1 : vector<8x8xf32>, vector<8x8xf32>, vector<8x8xf32>, vector<8x8xf32> -> vector<8x32xf32>
    %103 = arith.truncf %102 : vector<8x32xf32> to vector<8x32xbf16>
    %c0_30 = arith.constant 0 : index
    %c0_31 = arith.constant 0 : index
    %104 = vector.load %arg6[%c0_30, %c0_31] : memref<32x32xbf16, #tpu.memory_space<vmem>>, vector<32x32xbf16>
    %cst_32 = arith.constant dense<0.000000e+00> : vector<8x32xf32>
    %105 = tpu.matmul %103, %104, %cst_32 {dimension_numbers = #tpu.dot_dimension_numbers<[1], [0], [0], [1], [0, 0, 1, 1], [], []>} : vector<8x32xbf16>, vector<32x32xbf16>, vector<8x32xf32> -> vector<8x32xf32>
    %c0_33 = arith.constant 0 : index
    %c0_34 = arith.constant 0 : index
    %106 = vector.load %arg7[%c0_33, %c0_34] : memref<1x32xf32, #tpu.memory_space<vmem>>, vector<1x32xf32>
    %107 = vector.broadcast %106 : vector<1x32xf32> to vector<8x32xf32>
    %108 = arith.addf %105, %107 : vector<8x32xf32>
    %c0_35 = arith.constant 0 : index
    %c0_36 = arith.constant 0 : index
    %c0_37 = arith.constant 0 : index
    %109 = vector.load %arg8[%c0_35, %c0_36, %c0_37] : memref<1x8x32xf32, #tpu.memory_space<vmem>>, vector<1x8x32xf32>
    %110 = vector.shape_cast %109 : vector<1x8x32xf32> to vector<8x32xf32>
    %111 = vector.shape_cast %108 : vector<8x32xf32> to vector<1x8x32xf32>
    tpu.vector_store %arg8[%c0_35, %c0_36, %c0_37], %111 {strides = array<i32>} : memref<1x8x32xf32, #tpu.memory_space<vmem>>, vector<1x8x32xf32>,
    return
  }
  func.func @transform_0(%arg0: i32) -> (i32, i32, i32) {
    %c0_i32 = arith.constant 0 : i32
    %c0_i32_0 = arith.constant 0 : i32
    %c0_i32_1 = arith.constant 0 : i32
    return %arg0, %c0_i32, %c0_i32_0 : i32, i32, i32
  }
  func.func @transform_1(%arg0: i32) -> (i32, i32, i32) {
    %c0_i32 = arith.constant 0 : i32
    %c0_i32_0 = arith.constant 0 : i32
    %c0_i32_1 = arith.constant 0 : i32
    return %arg0, %c0_i32, %c0_i32_0 : i32, i32, i32
  }
  func.func @transform_2(%arg0: i32) -> (i32, i32, i32) {
    %c0_i32 = arith.constant 0 : i32
    %c0_i32_0 = arith.constant 0 : i32
    %c0_i32_1 = arith.constant 0 : i32
    return %arg0, %c0_i32, %c0_i32_0 : i32, i32, i32
  }
  func.func @transform_3(%arg0: i32) -> (i32, i32) {
    %c0_i32 = arith.constant 0 : i32
    %c0_i32_0 = arith.constant 0 : i32
    %c0_i32_1 = arith.constant 0 : i32
    return %c0_i32, %c0_i32_0 : i32, i32
  }
  func.func @transform_4(%arg0: i32) -> (i32, i32) {
    %c0_i32 = arith.constant 0 : i32
    %c0_i32_0 = arith.constant 0 : i32
    %c0_i32_1 = arith.constant 0 : i32
    return %c0_i32, %c0_i32_0 : i32, i32
  }
  func.func @transform_5(%arg0: i32) -> (i32, i32) {
    %c0_i32 = arith.constant 0 : i32
    %c0_i32_0 = arith.constant 0 : i32
    %c0_i32_1 = arith.constant 0 : i32
    return %c0_i32, %c0_i32_0 : i32, i32
  }
  func.func @transform_6(%arg0: i32) -> (i32, i32) {
    %c0_i32 = arith.constant 0 : i32
    %c0_i32_0 = arith.constant 0 : i32
    %c0_i32_1 = arith.constant 0 : i32
    return %c0_i32, %c0_i32_0 : i32, i32
  }
  func.func @transform_7(%arg0: i32) -> (i32, i32, i32) {
    %c0_i32 = arith.constant 0 : i32
    %c0_i32_0 = arith.constant 0 : i32
    %c0_i32_1 = arith.constant 0 : i32
    return %arg0, %c0_i32, %c0_i32_0 : i32, i32, i32
  }
}

</mosaic_0001>

<bundles_post_ra>
// kernel: tpu_custom_call.1
= control target key start
LH: loop header
LB: loop body
LE: loop exit
PB: predicated region body
PF: predicated region fallthrough
CT: control target
= control target key end

     0   :  { %s2101_s0 = inlined_call_operand.hbm [shape: f32[2,8,32], index: 0, kind: input, shape index: {}]   ;;  %s2102_s1 = inlined_call_operand.hbm [shape: f32[2,8,32], index: 1, kind: input, shape index: {}]   ;;  %s2103_s2 = inlined_call_operand.hbm [shape: f32[2,8,32], index: 2, kind: input, shape index: {}]   ;;  %s2104_s3 = inlined_call_operand.hbm [shape: bf16[32,96], index: 3, kind: input, shape index: {}]   ;;  %s2105_s4 = inlined_call_operand.vmem [shape: f32[1,96], index: 4, kind: input, shape index: {}]   ;;  %s2106_s5 = inlined_call_operand.vmem [shape: bf16[32,32], index: 5, kind: input, shape index: {}]   ;;  %s2107_s6 = inlined_call_operand.vmem [shape: f32[1,32], index: 6, kind: input, shape index: {}]   ;;  %s2108_s7 = inlined_call_operand.hbm [shape: f32[2,8,32], index: 7, kind: output, shape index: {}]  }
   0x1   :  { %2127 = sst [smem:[#allocation21_spill]] %s2102_s1 }
   0x2   :  { %2128 = sst [smem:[#allocation22_spill]] %s2107_s6 }
   0x3   :  { %2129 = sst [smem:[#allocation23_spill]] %s2108_s7 }
   0x4   :  { %12 = vsyncpa [#allocation3], 0 }
   0x5   :  { %14 = vsyncpa [#allocation3 + $0x1], 0 }
   0x6   :  { %15 = vsyncpa [#allocation6], 0 }
   0x7   :  { %17 = vsyncpa [#allocation6 + $0x1], 0 }
   0x8   :  { %18 = vsyncpa [#allocation9], 0 }
   0x9   :  { %19 = vsyncpa [#allocation4], 0 }
   0xa   :  { %21 = vsyncpa [#allocation4 + $0x1], 0  ;;  %s1718_s24 = smov 0   ;;  %s1720_s25 = smov 0  }
   0xb   :  { %s1722_s26 = smov 0   ;;  %s1724_s27 = smov 0  }
   0xc LB: > { %2130 = sst [smem:[#allocation15_spill]] %s1647_s24  ;;  %s1739_s28 = sadd.s32 1, %s1659_s27   ;;  %s1659_s27 = sphi %s1724_s27, %s2162_s27   ;;  %s1655_s26 = sphi %s1722_s26, %s2166_s26   ;;  %s1651_s25 = sphi %s1720_s25, %s2165_s25   ;;  %s1647_s24 = sphi %s1718_s24, %s2164_s24  }
   0xd   : > { %2131 = sst [smem:[#allocation16_spill]] %s1659_s27  ;;  %s34_s29 = sadd.s32 1, %s1655_s26 }
   0xe   : > { %2132 = sst [smem:[#allocation17_spill]] %s1739_s28  ;;  %s31_s30 = ssub.s32 %s1659_s27, %s1739_s28 }
   0xf   : > { %p2109_p0 = scmp.ne.s32.totalorder %s1655_s26, %s1651_s25  ;;  %p32_p1 = scmp.eq.s32.totalorder %s31_s30, 0 }
  0x10   : > { %p42_p2 = scmp.eq.s32.totalorder %s1659_s27, 0  ;;  %p1399_p4 = scmp.lt.s32.totalorder %s1659_s27, 2 }
  0x11   : > { %s1750_s8 = scalar_select %p32_p1, %s1655_s26, %s34_s29  }
  0x12   : > { %p43_p5 = por %p42_p2, %p2109_p0  ;;  %s2110_s9 = sand.u32 1, %s1655_s26  }
  0x13   : > { %2133 = sst [smem:[#allocation18_spill]] %s1750_s8  ;;  %s1758_s10 = sshll.u32 %s2110_s9, 3 }
  0x14   : > { %s1761_s11 = sshll.u32 %s1659_s27, 7  ;;  %p1763_p6 = pnand %p1399_p4, %p43_p5 }
  0x15   : > { %s273_s13 = sand.u32 1, %s1659_s27   ;;  %s2135_s1 = sld [smem:[#allocation21_spill]] }
  0x16   : > { %s2134_s12 = scalar_select %p1763_p6, 1, 0 }
  0x17   : > { %s277_s17 = scalar_lea.vmem [#allocation5], %s1758_s10  ;;  %s1777_s19 = scalar_lea.sflag [#allocation6], %s273_s13 }
  0x18   : > { %s284_s18 = sshll.u32 %s277_s17, 4  ;;  %p1783_p8 = pneg %p1763_p6  ;;  %s1775_s18 = int_to_ptr.vmem [resolvable:$true] %s284_s18 }
  0x1a   : > { %s2136_s21 = scalar_select %p1783_p8, 1, 0 }
  0x1b   : > { %s1772_s16 = scalar_lea.hbm %s2135_s1, %s1761_s11  ;;  %s1472_s29 = scalar_lea.hbm %s2135_s1, 256 }
  0x1c   : > { %s1467_s20 = scalar_lea.hbm %s1772_s16, 128  ;;  %p1473_p11 = scmp.lt.u32.totalorder %s1772_s16, %s2135_s1 }
  0x1d   : > { %p1468_p7 = scmp.ne.s32.totalorder %s1772_s16, %s1467_s20  ;;  %p1474_p12 = scmp.lt.u32.totalorder %s1472_s29, %s1467_s20 }
  0x1e   : > { %p1476_p1 = scmp.lt.u32.totalorder %s1467_s20, %s1772_s16 }
  0x1f   : > { %p1470_p9 = pnand %p1783_p8, %p1468_p7  ;;  %p1475_p13 = por %p1474_p12, %p1473_p11 }
  0x21   : > { %p1471_p10 = pneg %p1470_p9  ;;  %p1477_p2 = por %p1476_p1, %p1475_p13 }
  0x23   : > { %p1478_p4 = pnand %p1477_p2, %p1471_p10 }
  0x25   : > { %1481 = shalt.err (!%p1478_p4)
}
  0x26   : > { %s1482_s13 = scalar_lea.vmem %s1775_s18, 128  ;;  %s1661_s15 = smov [#allocation5]  }
  0x27   : > { %p1483_p5 = scmp.ne.s32.totalorder %s1775_s18, %s1482_s13  ;;  %s1487_s17 = sshll.u32 %s1661_s15, 4  ;;  %s1488_s17 = int_to_ptr.vmem [resolvable:$false] %s1487_s17 }
  0x28   : > { %s1489_s22 = scalar_lea.vmem %s1488_s17, 256  ;;  %p1490_p3 = scmp.lt.s32.totalorder %s1775_s18, %s1488_s17 }
  0x29   : > { %p1485_p7 = pnand %p1483_p5, %p1783_p8  ;;  %p1491_p0 = scmp.lt.s32.totalorder %s1489_s22, %s1482_s13 }
  0x2b   : > { %p1486_p9 = pneg %p1485_p7  ;;  %p1492_p11 = por %p1491_p0, %p1490_p3 }
  0x2d   : > { %p1493_p12 = pnand %p1492_p11, %p1486_p9 }
  0x2f   : > { %1496 = shalt.err (!%p1493_p12)
}
  0x30   : > { %1390 = dma.hbm_to_vmem [thread:$0]  (!%p1763_p6), %s1772_s16, 128, %s1775_s18, %s1777_s19  }
  0x31   : > { %s1808_s20 = sadd.s32 4294967295, %s1659_s27   ;;  %s1222_s23 = sadd.s32 4294967294, %s1659_s27  }
  0x32   : > { %p47_p0 = scmp.ne.s32.totalorder %s1651_s25, %s1647_s24  ;;  %p2117_p3 = scmp.eq.s32.totalorder %s1808_s20, 0 }
  0x33   : > { %p207_p10 = scmp.eq.s32.totalorder %s1808_s20, 1  ;;  %p213_p13 = scmp.eq.s32.totalorder %s1222_s23, 1 }
  0x34   : > { %p1817_p1 = por %p2117_p3, %p47_p0  ;;  %p1223_p2 = scmp.ge.s32.totalorder %s1659_s27, 1 }
  0x35   : > { %p2138_p4 = scmp.ne.s32.totalorder %s1655_s26, %s1651_s25  ;;  %p1829_p7 = por %p213_p13, %p47_p0 }
  0x36   : > { %s2137_s29 = scalar_select %p1817_p1, 1, 0 }
  0x37   : > { %p1825_p5 = por %p207_p10, %p2138_p4  ;;  %p220_p9 = scmp.lt.s32.totalorder %s1659_s27, 3 }
  0x38   : > { %s2141_s18 = scalar_select %p1829_p7, 1, 0 }
  0x39   : > { %s2139_s16 = scalar_select %p1825_p5, 1, 0 }
  0x3a   : > { %2142 = sst [smem:[#allocation20_spill]] %s2141_s18  ;;  %p1834_p11 = pnand %p1223_p2, %p220_p9 }
  0x3b   : > { %2140 = sst [smem:[#allocation19_spill]] %s2139_s16  ;;  %s1662_s14 = smov [#allocation8]  }
  0x3c   : > { %s2143_s30 = scalar_select %p1834_p11, 1, 0 }
  0x3d   : > { %s232_s13 = sshll.u32 %s1662_s14, 4  ;;  %p1380_p12 = pneg %p1834_p11  ;;  %s1838_s13 = int_to_ptr.vmem [resolvable:$true] %s232_s13 }
  0x3e   : > { %s1846_s22 = scalar_lea.hbm %s2101_s0, %s1761_s11  ;;  %s259_s9 = scalar_lea.vmem [#allocation2], %s1758_s10 }
  0x3f   : > { %p1850_p0 = pnand %p1380_p12, %p2117_p3  ;;  %s266_s1 = sshll.u32 %s259_s9, 4  ;;  %s1855_s1 = int_to_ptr.vmem [resolvable:$true] %s266_s1 }
  0x40   : > { %s1861_s28 = scalar_lea.hbm %s2103_s2, %s1761_s11  ;;  %s1497_s15 = scalar_lea.hbm %s2104_s3, 256 }
  0x41   : > { %p1498_p10 = scmp.ne.s32.totalorder %s2104_s3, %s1497_s15  ;;  %p1499_p13 = pneg %p1850_p0 }
  0x42   : > { %p1504_p9 = scmp.lt.u32.totalorder %s1497_s15, %s2104_s3 }
  0x43   : > { %p1500_p2 = pnand %p1499_p13, %p1498_p10 }
  0x45   : > { %p1501_p4 = pneg %p1500_p2 }
  0x47   : > { %p1506_p12 = pnand %p1504_p9, %p1501_p4 }
  0x49   : > { %1509 = shalt.err (!%p1506_p12)
}
  0x4a   : > { %s1510_s8 = scalar_lea.vmem %s1838_s13, 256  ;;  %p1518_p1 = scmp.lt.s32.totalorder %s1838_s13, %s1838_s13 }
  0x4b   : > { %p1511_p3 = scmp.ne.s32.totalorder %s1838_s13, %s1510_s8  ;;  %p1519_p11 = scmp.lt.s32.totalorder %s1510_s8, %s1510_s8 }
  0x4d   : > { %p1513_p7 = pnand %p1511_p3, %p1499_p13  ;;  %p1520_p6 = por %p1519_p11, %p1518_p1 }
  0x4f   : > { %p1514_p5 = pneg %p1513_p7 }
  0x51   : > { %p1521_p8 = pnand %p1520_p6, %p1514_p5 }
  0x53   : > { %1524 = shalt.err (!%p1521_p8)
}
  0x54   : > { %s1663_s24 = smov 64   ;;  %s1664_s7 = smov 4  }
  0x55   : > { %1383 = dma.hbm_to_vmem [thread:$0]  (!%p1850_p0), %s2104_s3, 256, %s1838_s13, [#allocation9], %s1663_s24, %s1663_s24, %s1664_s7  }
  0x56   : > { %s2145_s18 = sand.u32 1, %s1655_s26   ;;  %s1525_s15 = scalar_lea.hbm %s1846_s22, 128 }
  0x57   : > { %s256_s14 = scalar_lea.sflag [#allocation3], %s2145_s18  ;;  %p1526_p6 = scmp.ne.s32.totalorder %s1846_s22, %s1525_s15 }
  0x58   : > { %p2146_p8 = scmp.ne.s32.totalorder %s2136_s21, 0  ;;  %s1530_s8 = scalar_lea.hbm %s2101_s0, 256 }
  0x59   : > { %p1531_p5 = scmp.lt.u32.totalorder %s1846_s22, %s2101_s0  ;;  %p1532_p7 = scmp.lt.u32.totalorder %s1530_s8, %s1525_s15 }
  0x5a   : > { %p1528_p3 = pnand %p1526_p6, %p2146_p8  ;;  %p1534_p10 = scmp.lt.u32.totalorder %s1525_s15, %s1846_s22 }
  0x5b   : > { %p1533_p11 = por %p1532_p7, %p1531_p5 }
  0x5c   : > { %p1529_p1 = pneg %p1528_p3 }
  0x5d   : > { %p1535_p13 = por %p1534_p10, %p1533_p11 }
  0x5f   : > { %p1536_p0 = pnand %p1535_p13, %p1529_p1 }
  0x61   : > { %1539 = shalt.err (!%p1536_p0)
}
  0x62   : > { %s1540_s13 = scalar_lea.vmem %s1855_s1, 128  ;;  %s1665_s23 = smov [#allocation2]  }
  0x63   : > { %p1541_p2 = scmp.ne.s32.totalorder %s1855_s1, %s1540_s13  ;;  %s1545_s24 = sshll.u32 %s1665_s23, 4  ;;  %s1546_s24 = int_to_ptr.vmem [resolvable:$false] %s1545_s24 }
  0x64   : > { %s1547_s6 = scalar_lea.vmem %s1546_s24, 256  ;;  %p1548_p12 = scmp.lt.s32.totalorder %s1855_s1, %s1546_s24 }
  0x65   : > { %p1543_p4 = pnand %p1541_p2, %p2146_p8  ;;  %p1549_p6 = scmp.lt.s32.totalorder %s1547_s6, %s1540_s13 }
  0x67   : > { %p1544_p9 = pneg %p1543_p4  ;;  %p1550_p3 = por %p1549_p6, %p1548_p12 }
  0x69   : > { %p1551_p5 = pnand %p1550_p3, %p1544_p9 }
  0x6b   : > { %1554 = shalt.err (!%p1551_p5)
}
  0x6c   : > { %p2147_p1 = scmp.ne.s32.totalorder %s2134_s12, 0  ;;  %s295_s16 = scalar_lea.vmem [#allocation7], %s1758_s10 }
  0x6d   : > { %s302_s7 = sshll.u32 %s295_s16, 4  ;;  %s1555_s27 = scalar_lea.hbm %s1861_s28, 128  ;;  %s303_s7 = int_to_ptr.vmem [resolvable:$true] %s302_s7 }
  0x6e   : > { %1387 = dma.hbm_to_vmem [thread:$0]  (!%p2147_p1), %s1846_s22, 128, %s1855_s1, %s256_s14  }
  0x6f   : > { %p1556_p7 = scmp.ne.s32.totalorder %s1861_s28, %s1555_s27  ;;  %s1560_s15 = scalar_lea.hbm %s2103_s2, 256 }
  0x70   : > { %p1561_p13 = scmp.lt.u32.totalorder %s1861_s28, %s2103_s2  ;;  %p1562_p0 = scmp.lt.u32.totalorder %s1560_s15, %s1555_s27 }
  0x71   : > { %p1558_p11 = pnand %p1556_p7, %p2146_p8  ;;  %p1564_p4 = scmp.lt.u32.totalorder %s1555_s27, %s1861_s28 }
  0x72   : > { %p1563_p2 = por %p1562_p0, %p1561_p13 }
  0x73   : > { %p1559_p10 = pneg %p1558_p11 }
  0x74   : > { %p1565_p9 = por %p1564_p4, %p1563_p2 }
  0x76   : > { %p1566_p12 = pnand %p1565_p9, %p1559_p10 }
  0x78   : > { %1569 = shalt.err (!%p1566_p12)
}
  0x79   : > { %s1570_s1 = scalar_lea.vmem %s303_s7, 128  ;;  %s1666_s10 = smov [#allocation7]  }
  0x7a   : > { %p1571_p6 = scmp.ne.s32.totalorder %s303_s7, %s1570_s1  ;;  %s1575_s22 = sshll.u32 %s1666_s10, 4  ;;  %s1576_s22 = int_to_ptr.vmem [resolvable:$false] %s1575_s22 }
  0x7b   : > { %s1577_s14 = scalar_lea.vmem %s1576_s22, 256  ;;  %p1578_p7 = scmp.lt.s32.totalorder %s303_s7, %s1576_s22 }
  0x7c   : > { %p1573_p3 = pnand %p1571_p6, %p2146_p8  ;;  %p1579_p11 = scmp.lt.s32.totalorder %s1577_s14, %s1570_s1 }
  0x7e   : > { %p1574_p5 = pneg %p1573_p3  ;;  %p1580_p1 = por %p1579_p11, %p1578_p7 }
  0x80   : > { %p1581_p0 = pnand %p1580_p1, %p1574_p5 }
  0x82   : > { %1584 = shalt.err (!%p1581_p0)
}
  0x83   : > { %p2148_p13 = scmp.ne.s32.totalorder %s2134_s12, 0  ;;  %p2149_p10 = scmp.ne.s32.totalorder %s2143_s30, 0 }
  0x84   : > { %s1929_s21 = sand.u32 (!%p2149_p10), 1, %s1651_s25   ;;  %p2150_p8 = scmp.ne.s32.totalorder (!%p2149_p10), %s2137_s29, 0 }
  0x85   : > { %1393 = dma.hbm_to_vmem [thread:$0]  (!%p2148_p13), %s1861_s28, 128, %s303_s7, %s1777_s19  }
  0x86   : > { %311 = sbr.rel (%p2149_p10) target bundleno = 1723 (0x6bb), region = 48  ;;  %s1932_s8 = sshll.u32 (!%p2149_p10), %s1929_s21, 3 }
  0x87   : > { %s314_s13 = scalar_lea.sflag (!%p2149_p10), [#allocation3], %s1929_s21  ;;  %s317_s23 = scalar_lea.vmem (!%p2149_p10), [#allocation2], %s1932_s8 }
  0x8d   : > { %1630 = dma.done.wait (%p2150_p8), %s314_s13, 128  }
  0x8e   : > { %1632 = vsyncadd (%p2150_p8), %s314_s13, 4294967168  ;;  %s322_s28 = sand.u32 1, %s1808_s20   ;;  %s326_s19 = scalar_lea.vmem [#allocation5], %s1932_s8 }
  0x8f   : > { %s323_s12 = scalar_lea.sflag [#allocation6], %s322_s28 }
  0x90   : > { %1634 = dma.done.wait (%p2150_p8), %s323_s12, 256  }
  0x91   : > { %1636 = vsyncadd (%p2150_p8), %s323_s12, 4294967040  ;;  %s335_s30 = scalar_lea.vmem [#allocation7], %s1932_s8  ;;  %p2151_p1 = scmp.eq.s32.totalorder %s1808_s20, 0 }
  0x93   : > { %1638 = dma.done.wait (%p2151_p1), [#allocation9], 256   ;;  %p2152_p2 = pmov %p2151_p1 }
  0x94   : > { %v1667_v0 = vmov 0.0   ;;  %vm1668_vm0 = vmmov 0   ;;  %v1447_v1 = vld [vmem:[#allocation8] sm:$0xff]   ;;  %s1669_s29 = smov 96   ;;  %v1448_v2 = vld [vmem:[#allocation8 + $0x8] sm:$0xff]   ;;  %v386_v3 = vld [vmem:[%s317_s23] sm:$0xff] }
  0x95   : > { %1640 = vsyncadd (%p2152_p2), [#allocation9], 4294967040  ;;  %1288 = vmatprep.subr.bf16.mxu0 %v1667_v0  ;;  %1296 = vmatprep.subr.bf16.mxu1 %v1667_v0  ;;  %v1960_v4 = vld [vmem:[%s2105_s4] ss:$0 sm:$0xff]  ;;  %v387_v5 = vpack.c.bf16 %v386_v3, %v386_v3  ;;  %vm406_vm1 = vcmask 261120   ;;  %v450_v7 = vld [vmem:[%s326_s19] sm:$0xff] }
  0x96   : > { %1292 = vmatprep.mubr.msk.bf16.mxu0 %vm1668_vm0, %v1667_v0  ;;  %1300 = vmatprep.mubr.msk.bf16.mxu1 %vm1668_vm0, %v1667_v0  ;;  %v451_v9 = vpack.c.bf16 %v450_v7, %v450_v7  ;;  %s1670_s16 = smov 120   ;;  %s1671_s7 = smov 112   ;;  %vm561_vm2 = vcmask 64512   ;;  %v504_v33 = vld [vmem:[%s335_s30] sm:$0xff]  ;;  %vm623_vm3 = vcmask 1043456   ;;  %vm1013_vm4 = vcmask 130048  }
  0x97   : > { %452 = vrot.lane.b32.xlu0 %v1447_v1, %s1669_s29  ;;  %1289 = vmatpush3.bf16.msra.mxu0 %v1447_v1  ;;  %s1672_s27 = smov 104   ;;  %s1673_s11 = smov 64   ;;  %v505_v35 = vpack.c.bf16 %v504_v33, %v504_v33  ;;  %vm1015_vm5 = vcmask 195584  }
  0x98   : > { %1290 = vmatprep.subr.bf16.mxu0 %v1667_v0  ;;  %458 = vrot.lane.b32.xlu1 %v1960_v4, %s1669_s29  ;;  %s1674_s17 = smov 8   ;;  %s1675_s10 = smov 16  }
  0x99   : > { %s1676_s22 = smov 24   ;;  %s2153_s23 = sld [smem:[#allocation22_spill]] }
  0x9a   : > { %s2154_s28 = sld [smem:[#allocation19_spill]]  ;;  %s1257_s12 = sshll.u32 %s1808_s20, 7 }
  0x9b   : > { %454 = vrot.lane.b32.xlu0 %v1448_v2, %s1669_s29  ;;  %1291 = vmatpush3.bf16.msra.mxu0 %v1448_v2  ;;  %s379_s19 = scalar_lea.vmem [#allocation10], %s1932_s8  ;;  %s2155_s6 = sld [smem:[#allocation23_spill]] }
  0x9c   : > { %1304 = vmatprep.subr.bf16.mxu0 %v1667_v0  ;;  %s1099_s30 = sshll.u32 %s379_s19, 4  ;;  %s1086_s20 = scalar_lea.sflag [#allocation4], %s1929_s21  ;;  %s2058_s30 = int_to_ptr.vmem [resolvable:$true] %s1099_s30 }
  0x9d   : > { %s1585_s8 = scalar_lea.vmem %s2058_s30, 128 }
  0x9e   : > { %1293 = vmatmul.mubr.msk.bf16.vlgmr.msra.gmra.mrb[0].mxu0 %vm406_vm1, %v387_v5  ;;  %p1586_p4 = scmp.ne.s32.totalorder %s2058_s30, %s1585_s8 }
  0x9f   : > { %1308 = vmatprep.mubr.msk.bf16.mxu0 %vm1668_vm0, %v1667_v0 }
  0xa0   : > { %p2156_p9 = scmp.ne.s32.totalorder %s2154_s28, 0 }
  0xa2   : > { %p1587_p12 = pnand %p1586_p4, %p2156_p9 }
  0xa4   : > { %p1588_p6 = pneg %p1587_p12 }
 0x109   : > { %v453_v6 = vpop.permute.xlu0 %452 }
 0x10a   : > { %1297 = vmatpush3.bf16.msra.mxu1 %v453_v6  ;;  %v459_v16 = vpop.permute.xlu1 %458 }
 0x10b   : > { %1298 = vmatprep.subr.bf16.mxu1 %v1667_v0 }
 0x10d   : > { %v455_v8 = vpop.permute.xlu0 %454 }
 0x10e   : > { %1299 = vmatpush3.bf16.msra.mxu1 %v455_v8 }
 0x10f   : > { %1312 = vmatprep.subr.bf16.mxu1 %v1667_v0 }
 0x111   : > { %1301 = vmatmul.mubr.msk.bf16.vlgmr.msra.gmra.mrb[0].mxu1 %vm406_vm1, %v451_v9 }
 0x112   : > { %1314 = vmatprep.mubr.msk.bf16.mxu1 %vm1668_vm0, %v1667_v0 }
 0x171   : > { %v444_v10 = vpop.f32.mrb[0].mxu0 }
 0x172   : > { %v445_v11 = vadd.f32 %v1960_v4, %v444_v10  ;;  %v1294_v12 = vpop.f32.mrb[1].mxu0 }
 0x173   : > { %v447_v13 = vpop.f32.mrb[2].mxu0 }
 0x174   : > { %v558_v14 = vpack.c.bf16 %v445_v11, %v445_v11  ;;  %v1295_v15 = vpop.f32.mrb[3].mxu0 }
 0x176   : > { %668 = vrot.lane.b32.xlu0 %v558_v14, %s1670_s16 }
 0x17a   : > { %780 = vrot.lane.b32.xlu0 %v558_v14, %s1671_s7 }
 0x17e   : > { %890 = vrot.lane.b32.xlu0 %v558_v14, %s1672_s27 }
 0x182   : > { %508 = vrot.lane.b32.xlu0 %v1448_v2, %s1673_s11 }
 0x1e4   : > { %v498_v17 = vpop.f32.mrb[0].mxu1 }
 0x1e5   : > { %v499_v18 = vadd.f32 %v498_v17, %v459_v16  ;;  %v1302_v19 = vpop.f32.mrb[1].mxu1 }
 0x1e6   : > { %v501_v20 = vpop.f32.mrb[2].mxu1 }
 0x1e7   : > { %v559_v21 = vpack.c.bf16 %v499_v18, %v499_v18  ;;  %v1303_v22 = vpop.f32.mrb[3].mxu1 }
 0x1e8   : > { %v669_v24 = vpop.permute.xlu0 %668 }
 0x1e9   : > { %671 = vrot.lane.b32.xlu1 %v559_v21, %s1670_s16  ;;  %v566_v23 = vsel %vm561_vm2, %v559_v21, 0 }
 0x1ea   : > { %1313 = vmatpush3.bf16.xpose.msra.mxu1 %v566_v23 }
 0x1eb   : > { %1324 = vmatprep.subr.bf16.mxu1 %v1667_v0 }
 0x1ec   : > { %v781_v28 = vpop.permute.xlu0 %780 }
 0x1ed   : > { %782 = vrot.lane.b32.xlu1 %v559_v21, %s1671_s7 }
 0x1f0   : > { %v891_v31 = vpop.permute.xlu0 %890 }
 0x1f1   : > { %892 = vrot.lane.b32.xlu1 %v559_v21, %s1672_s27  ;;  %1315 = vmatmul.mubr.msk.bf16.vlgmr.msra.gmra.mrb[4].mxu1 %vm561_vm2, %v558_v14 }
 0x1f2   : > { %1326 = vmatprep.mubr.msk.bf16.mxu1 %vm1668_vm0, %v1667_v0 }
 0x1f4   : > { %v509_v34 = vpop.permute.xlu0 %508 }
 0x1f5   : > { %506 = vrot.lane.b32.xlu1 %v1447_v1, %s1673_s11 }
 0x25b   : > { %v672_v25 = vpop.permute.xlu1 %671 }
 0x25c   : > { %v677_v26 = vsel %vm561_vm2, %v672_v25, 0 }
 0x25d   : > { %1325 = vmatpush3.bf16.xpose.msra.mxu1 %v677_v26 }
 0x25e   : > { %1336 = vmatprep.subr.bf16.mxu1 %v1667_v0 }
 0x25f   : > { %v783_v27 = vpop.permute.xlu1 %782 }
 0x260   : > { %v788_v30 = vsel %vm561_vm2, %v783_v27, 0 }
 0x263   : > { %v893_v29 = vpop.permute.xlu1 %892 }
 0x264   : > { %1327 = vmatmul.mubr.msk.bf16.vlgmr.msra.gmra.mrb[8].mxu1 %vm561_vm2, %v669_v24  ;;  %v898_v36 = vsel %vm561_vm2, %v893_v29, 0 }
 0x265   : > { %1337 = vmatpush3.bf16.xpose.msra.mxu1 %v788_v30  ;;  %1338 = vmatprep.mubr.msk.bf16.mxu1 %vm1668_vm0, %v1667_v0 }
 0x266   : > { %1348 = vmatprep.subr.bf16.mxu1 %v1667_v0 }
 0x267   : > { %v507_v32 = vpop.permute.xlu1 %506 }
 0x268   : > { %1305 = vmatpush3.bf16.msra.mxu0 %v507_v32 }
 0x269   : > { %1306 = vmatprep.subr.bf16.mxu0 %v1667_v0 }
 0x26c   : > { %1339 = vmatmul.mubr.msk.bf16.vlgmr.msra.gmra.mrb[12].mxu1 %vm561_vm2, %v781_v28  ;;  %1307 = vmatpush3.bf16.msra.mxu0 %v509_v34 }
 0x26d   : > { %1349 = vmatpush3.bf16.xpose.msra.mxu1 %v898_v36  ;;  %1350 = vmatprep.mubr.msk.bf16.mxu1 %vm1668_vm0, %v1667_v0 }
 0x26e   : > { %1318 = vmatprep.subr.bf16.mxu0 %v1667_v0  ;;  %1360 = vmatprep.subr.bf16.mxu1 %v1667_v0 }
 0x26f   : > { %1309 = vmatmul.mubr.msk.bf16.vlgmr.msra.gmra.mrb[4].mxu0 %vm406_vm1, %v505_v35 }
 0x270   : > { %1320 = vmatprep.mubr.msk.bf16.mxu0 %vm1668_vm0, %v1667_v0 }
 0x274   : > { %1351 = vmatmul.mubr.msk.bf16.vlgmr.msra.gmra.mrb[16].mxu1 %vm561_vm2, %v891_v31 }
 0x275   : > { %1364 = vmatprep.mubr.msk.bf16.mxu1 %vm1668_vm0, %v1667_v0 }
 0x2c4   : > { %v602_v37 = vpop.f32.mrb[4].mxu1 }
 0x2c5   : > { %v1316_v38 = vpop.f32.mrb[5].mxu1  ;;  %v608_v39 = vsel %vm561_vm2, %v602_v37, -inf }
 0x2c6   : > { %609 = vmax.xlane.f32.xlu1 %v608_v39  ;;  %v605_v40 = vpop.f32.mrb[6].mxu1 }
 0x2c7   : > { %v1317_v41 = vpop.f32.mrb[7].mxu1 }
 0x337   : > { %v713_v42 = vpop.f32.mrb[8].mxu1 }
 0x338   : > { %v1328_v43 = vpop.f32.mrb[9].mxu1  ;;  %v719_v44 = vsel %vm561_vm2, %v713_v42, -inf }
 0x339   : > { %720 = vmax.xlane.f32.xlu0 %v719_v44  ;;  %v716_v45 = vpop.f32.mrb[10].mxu1 }
 0x33a   : > { %v1329_v46 = vpop.f32.mrb[11].mxu1 }
 0x33f   : > { %v824_v47 = vpop.f32.mrb[12].mxu1 }
 0x340   : > { %v1340_v48 = vpop.f32.mrb[13].mxu1  ;;  %v830_v49 = vsel %vm561_vm2, %v824_v47, -inf }
 0x341   : > { %831 = vmax.xlane.f32.xlu0 %v830_v49  ;;  %v827_v50 = vpop.f32.mrb[14].mxu1  ;;  %v1449_v48 = vld [vmem:[%s2106_s5] sm:$0xff]  }
 0x342   : > { %v1341_v51 = vpop.f32.mrb[15].mxu1  ;;  %v552_v62 = vpop.f32.mrb[4].mxu0  ;;  %1361 = vmatpush3.bf16.msra.mxu1 %v1449_v48 }
 0x343   : > { %v1310_v63 = vpop.f32.mrb[5].mxu0  ;;  %1362 = vmatprep.subr.bf16.mxu1 %v1667_v0 }
 0x344   : > { %v555_v1 = vpop.f32.mrb[6].mxu0 }
 0x345   : > { %v1311_v2 = vpop.f32.mrb[7].mxu0 }
 0x347   : > { %v934_v52 = vpop.f32.mrb[16].mxu1 }
 0x348   : > { %v1352_v53 = vpop.f32.mrb[17].mxu1  ;;  %v940_v54 = vsel %vm561_vm2, %v934_v52, -inf }
 0x349   : > { %941 = vmax.xlane.f32.xlu1 %v940_v54  ;;  %v937_v55 = vpop.f32.mrb[18].mxu1  ;;  %v1450_v53 = vld [vmem:[%s2106_s5 + $0x8] sm:$0xff]  }
 0x34a   : > { %v1353_v56 = vpop.f32.mrb[19].mxu1  ;;  %1363 = vmatpush3.bf16.msra.mxu1 %v1450_v53 }
 0x353   : > { %v610_v57 = vpop.xlane.xlu1 %609 }
 0x354   : > { %v611_v58 = vsub.f32 %v602_v37, %v610_v57 }
 0x356   : > { %v612_v59 = vmul.f32 1.442695, %v611_v58 }
 0x357   : > { %512 = vrot.lane.b32.xlu0 %v1960_v4, %s1673_s11 }
 0x358   : > { %1451 = vpow2.f32 %v612_v59 }
 0x362   : > { %v1452_v60 = vpop.eup %1451 }
 0x363   : > { %v614_v61 = vsel %vm561_vm2, %v1452_v60, 0.0 }
 0x364   : > { %615 = vadd.xlane.f32.xlu1 %v614_v61 }
 0x3c6   : > { %v721_v3 = vpop.xlane.xlu0 %720 }
 0x3c7   : > { %v722_v5 = vsub.f32 %v713_v42, %v721_v3 }
 0x3c9   : > { %v723_v6 = vmul.f32 1.442695, %v722_v5 }
 0x3cb   : > { %1453 = vpow2.f32 %v723_v6  ;;  %v1252_v6 = vld [vmem:[%s2153_s23] ss:$0 sm:$0xff] }
 0x3ce   : > { %v832_v7 = vpop.xlane.xlu0 %831 }
 0x3cf   : > { %v833_v8 = vsub.f32 %v824_v47, %v832_v7 }
 0x3d1   : > { %v834_v9 = vmul.f32 1.442695, %v833_v8 }
 0x3d2   : > { %v513_v10 = vpop.permute.xlu0 %512 }
 0x3d3   : > { %1455 = vpow2.f32 %v834_v9  ;;  %v553_v11 = vadd.f32 %v552_v62, %v513_v10 }
 0x3d5   : > { %v1454_v4 = vpop.eup %1453  ;;  %v560_v12 = vpack.c.bf16 %v553_v11, %v553_v11 }
 0x3d6   : > { %v942_v13 = vpop.xlane.xlu1 %941  ;;  %v725_v14 = vsel %vm561_vm2, %v1454_v4, 0.0 }
 0x3d7   : > { %v943_v15 = vsub.f32 %v934_v52, %v942_v13  ;;  %726 = vadd.xlane.f32.xlu1 %v725_v14  ;;  %v625_v16 = vsel %vm623_vm3, %v560_v12, 0  ;;  %842 = vrot.lane.b32.xlu0 %v560_v12, %s1671_s7  ;;  %s1677_s7 = smov [#allocation10]  }
 0x3d8   : > { %1319 = vmatpush3.bf16.msra.mxu0 %v625_v16 }
 0x3d9   : > { %v944_v17 = vmul.f32 1.442695, %v943_v15  ;;  %1330 = vmatprep.subr.bf16.mxu0 %v1667_v0 }
 0x3db   : > { %1457 = vpow2.f32 %v944_v17  ;;  %952 = vrot.lane.b32.xlu0 %v560_v12, %s1672_s27  ;;  %s1589_s27 = sshll.u32 %s1677_s7, 4  ;;  %s1590_s27 = int_to_ptr.vmem [resolvable:$false] %s1589_s27 }
 0x3dc   : > { %s1591_s11 = scalar_lea.vmem %s1590_s27, 256  ;;  %p1592_p3 = scmp.lt.s32.totalorder %s2058_s30, %s1590_s27 }
 0x3dd   : > { %v1456_v18 = vpop.eup %1455  ;;  %p1593_p5 = scmp.lt.s32.totalorder %s1591_s11, %s1585_s8 }
 0x3de   : > { %v836_v19 = vsel %vm561_vm2, %v1456_v18, 0.0 }
 0x3df   : > { %837 = vadd.xlane.f32.xlu1 %v836_v19  ;;  %p1594_p7 = por %p1593_p5, %p1592_p3 }
 0x3e1   : > { %p1595_p11 = pnand %p1594_p7, %p1588_p6 }
 0x3e5   : > { %v1458_v20 = vpop.eup %1457 }
 0x3e6   : > { %v946_v21 = vsel %vm561_vm2, %v1458_v20, 0.0 }
 0x3e7   : > { %947 = vadd.xlane.f32.xlu1 %v946_v21 }
 0x3f1   : > { %v616_v22 = vpop.xlane.xlu1 %615 }
 0x3f2   : > { %1459 = vrcp.f32 %v616_v22 }
 0x3f8   : > { %732 = vrot.lane.b32.xlu1 %v560_v12, %s1670_s16  ;;  %s2056_s16 = scalar_lea.hbm %s2155_s6, %s1257_s12 }
 0x3fc   : > { %v1460_v23 = vpop.eup %1459 }
 0x3fd   : > { %v618_v24 = vmul.f32 %v1460_v23, %v1452_v60 }
 0x3ff   : > { %v619_v25 = vpack.c.bf16 %v618_v24, %v618_v24 }
 0x401   : > { %1321 = vmatmul.mubr.msk.bf16.vlgmr.msra.gmra.mrb[8].mxu0 %vm561_vm2, %v619_v25 }
 0x402   : > { %1332 = vmatprep.mubr.msk.bf16.mxu0 %vm1668_vm0, %v1667_v0 }
 0x449   : > { %v843_v35 = vpop.permute.xlu0 %842 }
 0x44a   : > { %v848_v36 = vsel %vm623_vm3, %v843_v35, 0 }
 0x44d   : > { %v953_v38 = vpop.permute.xlu0 %952 }
 0x44e   : > { %v958_v41 = vsel %vm623_vm3, %v953_v38, 0 }
 0x464   : > { %v727_v26 = vpop.xlane.xlu1 %726 }
 0x465   : > { %1461 = vrcp.f32 %v727_v26 }
 0x46c   : > { %v838_v27 = vpop.xlane.xlu1 %837 }
 0x46d   : > { %1463 = vrcp.f32 %v838_v27 }
 0x46f   : > { %v1462_v28 = vpop.eup %1461 }
 0x470   : > { %v729_v30 = vmul.f32 %v1462_v28, %v1454_v4 }
 0x472   : > { %v730_v33 = vpack.c.bf16 %v729_v30, %v729_v30 }
 0x474   : > { %v948_v29 = vpop.xlane.xlu1 %947 }
 0x475   : > { %1465 = vrcp.f32 %v948_v29 }
 0x477   : > { %v1464_v34 = vpop.eup %1463 }
 0x478   : > { %v733_v31 = vpop.permute.xlu1 %732  ;;  %v840_v37 = vmul.f32 %v1464_v34, %v1456_v18 }
 0x479   : > { %v738_v32 = vsel %vm623_vm3, %v733_v31, 0 }
 0x47a   : > { %1331 = vmatpush3.bf16.msra.mxu0 %v738_v32  ;;  %v841_v39 = vpack.c.bf16 %v840_v37, %v840_v37 }
 0x47b   : > { %1342 = vmatprep.subr.bf16.mxu0 %v1667_v0 }
 0x47d   : > { %1333 = vmatmul.mubr.msk.bf16.vlgmr.msra.gmra.mrb[12].mxu0 %vm561_vm2, %v730_v33 }
 0x47e   : > { %1343 = vmatpush3.bf16.msra.mxu0 %v848_v36  ;;  %1344 = vmatprep.mubr.msk.bf16.mxu0 %vm1668_vm0, %v1667_v0 }
 0x47f   : > { %1354 = vmatprep.subr.bf16.mxu0 %v1667_v0  ;;  %v1466_v40 = vpop.eup %1465 }
 0x480   : > { %v950_v42 = vmul.f32 %v1466_v40, %v1458_v20 }
 0x482   : > { %v951_v43 = vpack.c.bf16 %v950_v42, %v950_v42 }
 0x485   : > { %1345 = vmatmul.mubr.msk.bf16.vlgmr.msra.gmra.mrb[16].mxu0 %vm561_vm2, %v841_v39 }
 0x486   : > { %1355 = vmatpush3.bf16.msra.mxu0 %v958_v41  ;;  %1356 = vmatprep.mubr.msk.bf16.mxu0 %vm1668_vm0, %v1667_v0 }
 0x48d   : > { %1357 = vmatmul.mubr.msk.bf16.vlgmr.msra.gmra.mrb[20].mxu0 %vm561_vm2, %v951_v43 }
 0x4d4   : > { %v661_v44 = vpop.f32.mrb[8].mxu0 }
 0x4d5   : > { %v1322_v45 = vpop.f32.mrb[9].mxu0 }
 0x4d6   : > { %v664_v46 = vpop.f32.mrb[10].mxu0 }
 0x4d7   : > { %v1323_v47 = vpop.f32.mrb[11].mxu0 }
 0x550   : > { %v774_v49 = vpop.f32.mrb[12].mxu0 }
 0x551   : > { %1001 = vrot.lane.b32.xlu0 %v774_v49, %s1674_s17  ;;  %v1334_v50 = vpop.f32.mrb[13].mxu0 }
 0x552   : > { %v777_v51 = vpop.f32.mrb[14].mxu0 }
 0x553   : > { %v1335_v52 = vpop.f32.mrb[15].mxu0 }
 0x558   : > { %v884_v54 = vpop.f32.mrb[16].mxu0 }
 0x559   : > { %1005 = vrot.lane.b32.xlu0 %v884_v54, %s1675_s10  ;;  %v1346_v55 = vpop.f32.mrb[17].mxu0 }
 0x55a   : > { %v887_v56 = vpop.f32.mrb[18].mxu0 }
 0x55b   : > { %v1347_v57 = vpop.f32.mrb[19].mxu0 }
 0x560   : > { %v994_v58 = vpop.f32.mrb[20].mxu0 }
 0x561   : > { %1009 = vrot.lane.b32.xlu1 %v994_v58, %s1676_s22  ;;  %v1358_v0 = vpop.f32.mrb[21].mxu0 }
 0x562   : > { %v997_v59 = vpop.f32.mrb[22].mxu0 }
 0x563   : > { %v1359_v60 = vpop.f32.mrb[23].mxu0 }
 0x5c3   : > { %v1002_v61 = vpop.permute.xlu0 %1001 }
 0x5c4   : > { %v1012_v63 = vsel %vm561_vm2, %v661_v44, %v1002_v61 }
 0x5cb   : > { %v1006_v62 = vpop.permute.xlu0 %1005 }
 0x5cc   : > { %v1014_v1 = vsel %vm1013_vm4, %v1012_v63, %v1006_v62 }
 0x5d3   : > { %v1010_v2 = vpop.permute.xlu1 %1009 }
 0x5d4   : > { %v1016_v3 = vsel %vm1015_vm5, %v1014_v1, %v1010_v2 }
 0x5d5   : > { %v1017_v5 = vpack.c.bf16 %v1016_v3, %v1016_v3 }
 0x5d7   : > { %1365 = vmatmul.mubr.msk.bf16.vlgmr.msra.gmra.mrb[20].mxu1 %vm406_vm1, %v1017_v5 }
 0x6aa   : > { %v1078_v7 = vpop.f32.mrb[20].mxu1 }
 0x6ab   : > { %v1079_v8 = vadd.f32 %v1252_v6, %v1078_v7  ;;  %v1366_v9 = vpop.f32.mrb[21].mxu1 }
 0x6ac   : > { %v1081_v10 = vpop.f32.mrb[22].mxu1 }
 0x6ad   : > { %v1367_v11 = vpop.f32.mrb[23].mxu1  ;;  %1084 = vst.msk [vmem:[%s379_s19] sm:$0xff] %vm406_vm1, %v1079_v8 }
 0x6ae   : > { %1598 = shalt.err (!%p1595_p11)
}
 0x6af   : > { %s1599_s21 = scalar_lea.hbm %s2056_s16, 128  ;;  %s1603_s17 = scalar_lea.hbm %s2155_s6, 256 }
 0x6b0   : > { %p1600_p0 = scmp.ne.s32.totalorder %s2056_s16, %s1599_s21  ;;  %p1604_p8 = scmp.lt.u32.totalorder %s2056_s16, %s2155_s6 }
 0x6b1   : > { %p1605_p1 = scmp.lt.u32.totalorder %s1603_s17, %s1599_s21  ;;  %p1607_p4 = scmp.lt.u32.totalorder %s1599_s21, %s2056_s16 }
 0x6b2   : > { %p1601_p13 = pnand %p1600_p0, %p2156_p9 }
 0x6b3   : > { %p1606_p2 = por %p1605_p1, %p1604_p8 }
 0x6b4   : > { %p1602_p10 = pneg %p1601_p13 }
 0x6b5   : > { %p1608_p12 = por %p1607_p4, %p1606_p2 }
 0x6b7   : > { %p1609_p6 = pnand %p1608_p12, %p1602_p10 }
 0x6b9   : > { %1612 = shalt.err (!%p1609_p6)
}
 0x6ba   : > { %1378 = dma.vmem_to_hbm [thread:$0]  (%p2156_p9), %s2058_s30, 128, %s2056_s16, %s1086_s20  }
 0x6bb PF: > { %s2157_s10 = sld [smem:[#allocation15_spill]]  ;;  %s2158_s22 = sld [smem:[#allocation20_spill]] }
 0x6bc   : > { %s2159_s14 = sld [smem:[#allocation16_spill]] }
 0x6c1   : > { %s1111_s13 = sand.u32 1, %s2157_s10   ;;  %p2160_p3 = scmp.ne.s32.totalorder %s2158_s22, 0 }
 0x6c2   : > { %p2161_p5 = scmp.ge.s32.totalorder %s2159_s14, 2  ;;  %s1112_s23 = scalar_lea.sflag [#allocation4], %s1111_s13 }
 0x6c4   : > { %p1395_p7 = pnand %p2161_p5, %p2160_p3 }
 0x6c6   : > { %1642 = dma.done.wait (!%p1395_p7), %s1112_s23, 128  }
 0x6c7   : > { %1644 = vsyncadd (!%p1395_p7), %s1112_s23, 4294967168  ;;  %s2162_s27 = sld [smem:[#allocation17_spill]]  ;;  %s2163_s12 = sld [smem:[#allocation18_spill]] }
 0x6c8   : > { %s2164_s24 = smov %s1651_s25  ;;  %s2165_s25 = smov %s1655_s26 }
 0x6cd   : > { %p24_p11 = scmp.ge.s32.totalorder %s2162_s27, 4   ;;  %s2166_s26 = smov %s2163_s12 }
 0x6cf   :  { %26 = sbr.rel (!%p24_p11) target bundleno = 12 (0xc), region = 121 }
 0x6d6   :  { %1117 = vsyncpa [#allocation3], 1 }
 0x6d7   :  { %1119 = vsyncpa [#allocation3 + $0x1], 1 }
 0x6d8   :  { %1120 = vsyncpa [#allocation6], 1 }
 0x6d9   :  { %1122 = vsyncpa [#allocation6 + $0x1], 1 }
 0x6da   :  { %1123 = vsyncpa [#allocation9], 1 }
 0x6db   :  { %1124 = vsyncpa [#allocation4], 1 }
 0x6dc   :  { %1126 = vsyncpa [#allocation4 + $0x1], 1 }

</bundles_post_ra>
